<compile_context>
chip_gen: v7x
topology: tpu7x:2x2x1
jax: 0.10.0
libtpu: 0.0.40
codegen_flags: <defaults>
</compile_context>

<pallas_src>
import math

import jax
import jax.numpy as jnp
import numpy as np
from jax.experimental import pallas as pl
from jax.experimental.pallas import tpu as pltpu

F = 8          # padded feature width (covers 2, 5, 1); f32 sublane tile
TILE_N = 128   # batch-row tile per grid step
N_LAYERS = 6
# logical layer sizes from the PyTorch module: 2 -> 5 -> 5 -> 5 -> 5 -> 5 -> 1
LAYER_DIMS = [(2, 5), (5, 5), (5, 5), (5, 5), (5, 5), (5, 1)]


def mlp_kernel(x_ref, w_ref, b_ref, o_ref):
    """All 6 layers fused, operating on one (TILE_N, F) row tile in VMEM.

    w_ref: (6, F, F) stacked zero-padded weights, b_ref: (6, 1, F) biases.
    Static Python indexing w_ref[i] / b_ref[i] keeps everything unrolled.
    """
    h = x_ref[...]
    for i in range(N_LAYERS - 1):
        h = jax.nn.sigmoid(
            jnp.dot(h, w_ref[i], preferred_element_type=jnp.float32) + b_ref[i])
    o_ref[...] = (jnp.dot(h, w_ref[N_LAYERS - 1],
                          preferred_element_type=jnp.float32)
                  + b_ref[N_LAYERS - 1])


def pack_params(weights, biases):
    """One-time packing: zero-pad to (F, F)/(1, F) and stack all 6 layers."""
    W = jnp.zeros((N_LAYERS, F, F), jnp.float32)
    B = jnp.zeros((N_LAYERS, 1, F), jnp.float32)
    for i, (w, b) in enumerate(zip(weights, biases)):
        W = W.at[i, : w.shape[0], : w.shape[1]].set(w)
        B = B.at[i, 0, : b.shape[0]].set(b)
    return W, B


@jax.jit
def net_forward(x, t, W, B):
    """x, t: (N, 1) float32; W: (6,F,F); B: (6,1,F).  Returns (N, 1) float32."""
    n = x.shape[0]
    n_pad = pl.cdiv(n, TILE_N) * TILE_N
    inputs = jnp.concatenate([x, t], axis=1)                        # (n, 2)
    x_pad = jnp.zeros((n_pad, F), jnp.float32).at[:n, :2].set(inputs)

    row_spec = pl.BlockSpec((TILE_N, F), lambda i: (i, 0))
    vmem_full = pl.BlockSpec(memory_space=pltpu.MemorySpace.VMEM)   # whole array, resident

    flops = 2 * n_pad * F * F * N_LAYERS
    transcendentals = (N_LAYERS - 1) * n_pad * F
    bytes_accessed = 4 * (2 * n_pad * F + N_LAYERS * F * F + N_LAYERS * F)

    out_pad = pl.pallas_call(
        mlp_kernel,
        out_shape=jax.ShapeDtypeStruct((n_pad, F), jnp.float32),
        grid=(n_pad // TILE_N,),
        in_specs=[row_spec, vmem_full, vmem_full],
        out_specs=row_spec,
        compiler_params=pltpu.CompilerParams(
            dimension_semantics=("parallel",)),   # batch axis -> both TCs on v7x
        cost_estimate=pl.CostEstimate(
            flops=flops, transcendentals=transcendentals,
            bytes_accessed=bytes_accessed),
    )(x_pad, W, B)
    return out_pad[:n, :1]                                          # (N, 1)


def init_params(key):
    """Deterministic PyTorch-style Linear init: U(-1/sqrt(fan_in), 1/sqrt(fan_in))."""
    weights, biases = [], []
    for (fan_in, fan_out) in LAYER_DIMS:
        key, kw, kb = jax.random.split(key, 3)
        bound = 1.0 / math.sqrt(fan_in)
        # stored as (in, out) so the kernel computes h @ W (== x @ W_torch.T)
        w = jax.random.uniform(kw, (fan_in, fan_out), jnp.float32, -bound, bound)
        b = jax.random.uniform(kb, (fan_out,), jnp.float32, -bound, bound)
        weights.append(w)
        biases.append(b)
    return weights, biases


def net_forward_ref(x, t, weights, biases):
    """Plain-JAX reference for correctness checking."""
    h = jnp.concatenate([x, t], axis=1)
    for i in range(N_LAYERS - 1):
        h = jax.nn.sigmoid(h @ weights[i] + biases[i])
    return h @ weights[N_LAYERS - 1] + biases[N_LAYERS - 1]


if __name__ == "__main__":
    key = jax.random.PRNGKey(0)
    kp, kx, kt = jax.random.split(key, 3)
    weights, biases = init_params(kp)

    # pack/pad parameters ONCE; reused across every forward call
    W, B = pack_params(weights, biases)

    N = 256   # batched evaluation points (typical PINN usage); 2 row tiles
    x = jax.random.normal(kx, (N, 1), jnp.float32)
    t = jax.random.normal(kt, (N, 1), jnp.float32)

    out = net_forward(x, t, W, B)
    out = jax.block_until_ready(out)

    ref = net_forward_ref(x, t, weights, biases)
    np.testing.assert_allclose(np.asarray(out), np.asarray(ref),
                               rtol=1e-5, atol=1e-5)

    print("KERNEL_OK")
</pallas_src>

<mosaic_0001>
module attributes {stable_mosaic.version = 11 : i64} {
  func.func @mlp_kernel(%arg0: i32, %arg1: memref<128x8xf32, #tpu.memory_space<vmem>>, %arg2: memref<6x8x8xf32, #tpu.memory_space<vmem>>, %arg3: memref<6x1x8xf32, #tpu.memory_space<vmem>>, %arg4: memref<128x8xf32, #tpu.memory_space<vmem>>) attributes {dimension_semantics = [#tpu.dimension_semantics<parallel>], iteration_bounds = array<i64: 2>, scalar_prefetch = 0 : i64, scratch_operands = 0 : i64, tpu.core_type = #tpu.core_type<tc>, window_params = [{transform_indices = @transform_0, window_bounds = array<i64: 128, 8>}, {pipeline_mode = #tpu.pipeline_mode<synchronous>, transform_indices = @transform_1, window_bounds = array<i64: 6, 8, 8>}, {pipeline_mode = #tpu.pipeline_mode<synchronous>, transform_indices = @transform_2, window_bounds = array<i64: 6, 1, 8>}, {transform_indices = @transform_3, window_bounds = array<i64: 128, 8>}]} {
    %c0 = arith.constant 0 : index
    %c0_0 = arith.constant 0 : index
    %0 = vector.load %arg1[%c0, %c0_0] : memref<128x8xf32, #tpu.memory_space<vmem>>, vector<128x8xf32>
    %c0_1 = arith.constant 0 : index
    %c0_2 = arith.constant 0 : index
    %c0_3 = arith.constant 0 : index
    %1 = vector.load %arg2[%c0_1, %c0_2, %c0_3] : memref<6x8x8xf32, #tpu.memory_space<vmem>>, vector<1x8x8xf32>
    %2 = vector.shape_cast %1 : vector<1x8x8xf32> to vector<8x8xf32>
    %cst = arith.constant dense<0.000000e+00> : vector<128x8xf32>
    %3 = tpu.matmul %0, %2, %cst {dimension_numbers = #tpu.dot_dimension_numbers<[1], [0], [0], [1], [0, 0, 1, 1], [], []>} : vector<128x8xf32>, vector<8x8xf32>, vector<128x8xf32> -> vector<128x8xf32>
    %c0_4 = arith.constant 0 : index
    %c0_5 = arith.constant 0 : index
    %c0_6 = arith.constant 0 : index
    %4 = vector.load %arg3[%c0_4, %c0_5, %c0_6] : memref<6x1x8xf32, #tpu.memory_space<vmem>>, vector<1x1x8xf32>
    %5 = vector.shape_cast %4 : vector<1x1x8xf32> to vector<1x8xf32>
    %6 = vector.broadcast %5 : vector<1x8xf32> to vector<128x8xf32>
    %7 = arith.addf %3, %6 : vector<128x8xf32>
    %8 = arith.negf %7 : vector<128x8xf32>
    %9 = math.exp %8 : vector<128x8xf32>
    %cst_7 = arith.constant 1.000000e+00 : f32
    %10 = vector.broadcast %cst_7 : f32 to vector<128x8xf32>
    %11 = arith.addf %10, %9 : vector<128x8xf32>
    %12 = arith.divf %10, %11 : vector<128x8xf32>
    %c1 = arith.constant 1 : index
    %c0_8 = arith.constant 0 : index
    %c0_9 = arith.constant 0 : index
    %13 = vector.load %arg2[%c1, %c0_8, %c0_9] : memref<6x8x8xf32, #tpu.memory_space<vmem>>, vector<1x8x8xf32>
    %14 = vector.shape_cast %13 : vector<1x8x8xf32> to vector<8x8xf32>
    %cst_10 = arith.constant dense<0.000000e+00> : vector<128x8xf32>
    %15 = tpu.matmul %12, %14, %cst_10 {dimension_numbers = #tpu.dot_dimension_numbers<[1], [0], [0], [1], [0, 0, 1, 1], [], []>} : vector<128x8xf32>, vector<8x8xf32>, vector<128x8xf32> -> vector<128x8xf32>
    %c1_11 = arith.constant 1 : index
    %c0_12 = arith.constant 0 : index
    %c0_13 = arith.constant 0 : index
    %16 = vector.load %arg3[%c1_11, %c0_12, %c0_13] : memref<6x1x8xf32, #tpu.memory_space<vmem>>, vector<1x1x8xf32>
    %17 = vector.shape_cast %16 : vector<1x1x8xf32> to vector<1x8xf32>
    %18 = vector.broadcast %17 : vector<1x8xf32> to vector<128x8xf32>
    %19 = arith.addf %15, %18 : vector<128x8xf32>
    %20 = arith.negf %19 : vector<128x8xf32>
    %21 = math.exp %20 : vector<128x8xf32>
    %cst_14 = arith.constant 1.000000e+00 : f32
    %22 = vector.broadcast %cst_14 : f32 to vector<128x8xf32>
    %23 = arith.addf %22, %21 : vector<128x8xf32>
    %24 = arith.divf %22, %23 : vector<128x8xf32>
    %c2 = arith.constant 2 : index
    %c0_15 = arith.constant 0 : index
    %c0_16 = arith.constant 0 : index
    %25 = vector.load %arg2[%c2, %c0_15, %c0_16] : memref<6x8x8xf32, #tpu.memory_space<vmem>>, vector<1x8x8xf32>
    %26 = vector.shape_cast %25 : vector<1x8x8xf32> to vector<8x8xf32>
    %cst_17 = arith.constant dense<0.000000e+00> : vector<128x8xf32>
    %27 = tpu.matmul %24, %26, %cst_17 {dimension_numbers = #tpu.dot_dimension_numbers<[1], [0], [0], [1], [0, 0, 1, 1], [], []>} : vector<128x8xf32>, vector<8x8xf32>, vector<128x8xf32> -> vector<128x8xf32>
    %c2_18 = arith.constant 2 : index
    %c0_19 = arith.constant 0 : index
    %c0_20 = arith.constant 0 : index
    %28 = vector.load %arg3[%c2_18, %c0_19, %c0_20] : memref<6x1x8xf32, #tpu.memory_space<vmem>>, vector<1x1x8xf32>
    %29 = vector.shape_cast %28 : vector<1x1x8xf32> to vector<1x8xf32>
    %30 = vector.broadcast %29 : vector<1x8xf32> to vector<128x8xf32>
    %31 = arith.addf %27, %30 : vector<128x8xf32>
    %32 = arith.negf %31 : vector<128x8xf32>
    %33 = math.exp %32 : vector<128x8xf32>
    %cst_21 = arith.constant 1.000000e+00 : f32
    %34 = vector.broadcast %cst_21 : f32 to vector<128x8xf32>
    %35 = arith.addf %34, %33 : vector<128x8xf32>
    %36 = arith.divf %34, %35 : vector<128x8xf32>
    %c3 = arith.constant 3 : index
    %c0_22 = arith.constant 0 : index
    %c0_23 = arith.constant 0 : index
    %37 = vector.load %arg2[%c3, %c0_22, %c0_23] : memref<6x8x8xf32, #tpu.memory_space<vmem>>, vector<1x8x8xf32>
    %38 = vector.shape_cast %37 : vector<1x8x8xf32> to vector<8x8xf32>
    %cst_24 = arith.constant dense<0.000000e+00> : vector<128x8xf32>
    %39 = tpu.matmul %36, %38, %cst_24 {dimension_numbers = #tpu.dot_dimension_numbers<[1], [0], [0], [1], [0, 0, 1, 1], [], []>} : vector<128x8xf32>, vector<8x8xf32>, vector<128x8xf32> -> vector<128x8xf32>
    %c3_25 = arith.constant 3 : index
    %c0_26 = arith.constant 0 : index
    %c0_27 = arith.constant 0 : index
    %40 = vector.load %arg3[%c3_25, %c0_26, %c0_27] : memref<6x1x8xf32, #tpu.memory_space<vmem>>, vector<1x1x8xf32>
    %41 = vector.shape_cast %40 : vector<1x1x8xf32> to vector<1x8xf32>
    %42 = vector.broadcast %41 : vector<1x8xf32> to vector<128x8xf32>
    %43 = arith.addf %39, %42 : vector<128x8xf32>
    %44 = arith.negf %43 : vector<128x8xf32>
    %45 = math.exp %44 : vector<128x8xf32>
    %cst_28 = arith.constant 1.000000e+00 : f32
    %46 = vector.broadcast %cst_28 : f32 to vector<128x8xf32>
    %47 = arith.addf %46, %45 : vector<128x8xf32>
    %48 = arith.divf %46, %47 : vector<128x8xf32>
    %c4 = arith.constant 4 : index
    %c0_29 = arith.constant 0 : index
    %c0_30 = arith.constant 0 : index
    %49 = vector.load %arg2[%c4, %c0_29, %c0_30] : memref<6x8x8xf32, #tpu.memory_space<vmem>>, vector<1x8x8xf32>
    %50 = vector.shape_cast %49 : vector<1x8x8xf32> to vector<8x8xf32>
    %cst_31 = arith.constant dense<0.000000e+00> : vector<128x8xf32>
    %51 = tpu.matmul %48, %50, %cst_31 {dimension_numbers = #tpu.dot_dimension_numbers<[1], [0], [0], [1], [0, 0, 1, 1], [], []>} : vector<128x8xf32>, vector<8x8xf32>, vector<128x8xf32> -> vector<128x8xf32>
    %c4_32 = arith.constant 4 : index
    %c0_33 = arith.constant 0 : index
    %c0_34 = arith.constant 0 : index
    %52 = vector.load %arg3[%c4_32, %c0_33, %c0_34] : memref<6x1x8xf32, #tpu.memory_space<vmem>>, vector<1x1x8xf32>
    %53 = vector.shape_cast %52 : vector<1x1x8xf32> to vector<1x8xf32>
    %54 = vector.broadcast %53 : vector<1x8xf32> to vector<128x8xf32>
    %55 = arith.addf %51, %54 : vector<128x8xf32>
    %56 = arith.negf %55 : vector<128x8xf32>
    %57 = math.exp %56 : vector<128x8xf32>
    %cst_35 = arith.constant 1.000000e+00 : f32
    %58 = vector.broadcast %cst_35 : f32 to vector<128x8xf32>
    %59 = arith.addf %58, %57 : vector<128x8xf32>
    %60 = arith.divf %58, %59 : vector<128x8xf32>
    %c5 = arith.constant 5 : index
    %c0_36 = arith.constant 0 : index
    %c0_37 = arith.constant 0 : index
    %61 = vector.load %arg2[%c5, %c0_36, %c0_37] : memref<6x8x8xf32, #tpu.memory_space<vmem>>, vector<1x8x8xf32>
    %62 = vector.shape_cast %61 : vector<1x8x8xf32> to vector<8x8xf32>
    %cst_38 = arith.constant dense<0.000000e+00> : vector<128x8xf32>
    %63 = tpu.matmul %60, %62, %cst_38 {dimension_numbers = #tpu.dot_dimension_numbers<[1], [0], [0], [1], [0, 0, 1, 1], [], []>} : vector<128x8xf32>, vector<8x8xf32>, vector<128x8xf32> -> vector<128x8xf32>
    %c5_39 = arith.constant 5 : index
    %c0_40 = arith.constant 0 : index
    %c0_41 = arith.constant 0 : index
    %64 = vector.load %arg3[%c5_39, %c0_40, %c0_41] : memref<6x1x8xf32, #tpu.memory_space<vmem>>, vector<1x1x8xf32>
    %65 = vector.shape_cast %64 : vector<1x1x8xf32> to vector<1x8xf32>
    %66 = vector.broadcast %65 : vector<1x8xf32> to vector<128x8xf32>
    %67 = arith.addf %63, %66 : vector<128x8xf32>
    %c0_42 = arith.constant 0 : index
    %c0_43 = arith.constant 0 : index
    %68 = vector.load %arg4[%c0_42, %c0_43] : memref<128x8xf32, #tpu.memory_space<vmem>>, vector<128x8xf32>
    tpu.vector_store %arg4[%c0_42, %c0_43], %67 {strides = array<i32>} : memref<128x8xf32, #tpu.memory_space<vmem>>, vector<128x8xf32>,
    return
  }
  func.func @transform_0(%arg0: i32) -> (i32, i32) {
    %c0_i32 = arith.constant 0 : i32
    %c0_i32_0 = arith.constant 0 : i32
    return %arg0, %c0_i32 : i32, i32
  }
  func.func @transform_1(%arg0: i32) -> (i32, i32, i32) {
    %c0_i32 = arith.constant 0 : i32
    %c0_i32_0 = arith.constant 0 : i32
    %c0_i32_1 = arith.constant 0 : i32
    %c0_i32_2 = arith.constant 0 : i32
    return %c0_i32, %c0_i32_0, %c0_i32_1 : i32, i32, i32
  }
  func.func @transform_2(%arg0: i32) -> (i32, i32, i32) {
    %c0_i32 = arith.constant 0 : i32
    %c0_i32_0 = arith.constant 0 : i32
    %c0_i32_1 = arith.constant 0 : i32
    %c0_i32_2 = arith.constant 0 : i32
    return %c0_i32, %c0_i32_0, %c0_i32_1 : i32, i32, i32
  }
  func.func @transform_3(%arg0: i32) -> (i32, i32) {
    %c0_i32 = arith.constant 0 : i32
    %c0_i32_0 = arith.constant 0 : i32
    return %arg0, %c0_i32 : i32, i32
  }
}

</mosaic_0001>

<bundles_post_ra>
// kernel: net_forward.1
= control target key start
LH: loop header
LB: loop body
LE: loop exit
PB: predicated region body
PF: predicated region fallthrough
CT: control target
= control target key end

     0   :  { %s2776_s12 = smov 0   ;;  %s3074_s0 = inlined_call_operand.vmem [shape: f32[256,8], index: 0, kind: input, shape index: {}]   ;;  %s3075_s1 = inlined_call_operand.vmem [shape: f32[6,8,8], index: 1, kind: input, shape index: {}]   ;;  %s3076_s2 = inlined_call_operand.vmem [shape: f32[6,1,8], index: 2, kind: input, shape index: {}]   ;;  %s3077_s3 = inlined_call_operand.vmem [shape: f32[256,8], index: 3, kind: output, shape index: {}]  }
   0x1 LB: > { %s1959_s13 = sadd.s32 4294967295, %s2754_s12   ;;  %p1963_p0 = scmp.ge.s32.totalorder %s2754_s12, 1  ;;  %s2754_s12 = sphi %s2776_s12, %s13_s12  }
   0x2   : > { %p138_p1 = scmp.lt.s32.totalorder %s2754_s12, 3 }
   0x4   : > { %p139_p2 = pnand %p1963_p0, %p138_p1 }
   0x5   : > { %v190_v0 = vld [vmem:[%s3075_s1] sm:$0xff] (!%p139_p2)  ;;  %s1964_s16 = sshll.u32 (!%p139_p2), %s1959_s13, 4  ;;  %vm198_vm0 = vcmask (!%p139_p2), 64512   ;;  %v2001_v17 = vld [vmem:[%s3075_s1 + $0x8] sm:$0xff] (!%p139_p2)  ;;  %v2036_v18 = vld [vmem:[%s3075_s1 + $0x10] sm:$0xff] (!%p139_p2) }
   0x6   : > { %142 = sbr.rel (%p139_p2) target bundleno = 1478 (0x5c6), region = 32  ;;  %2264 = vmatprep.subr.mxu0 (!%p139_p2), %v190_v0  ;;  %p163_p3 = scmp.lt.s32.totalorder (!%p139_p2), %s1964_s16, 31  ;;  %2290 = vmatprep.subr.mxu1 (!%p139_p2), %v2001_v17  ;;  %v2838_v19 = vld [vmem:[%s3076_s2] ss:$0 sm:$0xff] (!%p139_p2) }
   0x7   : > { %2265 = vmatpush3.msra.mxu0 (!%p139_p2), %v190_v0  ;;  %2291 = vmatpush3.msra.mxu1 (!%p139_p2), %v2001_v17 }
   0x8   : > { %2316 = vmatprep.subr.mxu0 (!%p139_p2), %v2036_v18 }
   0xd   : > { %s3079_s16 = smov (!%p163_p3, %s1964_s16), 31 }
   0xe   : > { %s1965_s17 = sshll.u32 %s3079_s16, 3 }
   0xf   : > { %s2795_s20 = scalar_lea.vmem %s3074_s0, %s1965_s17  ;;  %s3037_s21 = scalar_lea.vmem %s3077_s3, %s1965_s17 }
  0x10   : > { %v174_v1 = vld [vmem:[%s2795_s20] sm:$0xff]  ;;  %v175_v2 = vld [vmem:[%s2795_s20 + $0x8] sm:$0xff]  ;;  %v176_v3 = vld [vmem:[%s2795_s20 + $0x10] sm:$0xff] }
  0x11   : > { %2266 = vmatprep.mubr.msk.f32.mxu0 %vm198_vm0, %v174_v1  ;;  %v177_v4 = vld [vmem:[%s2795_s20 + $0x18] sm:$0xff]  ;;  %v178_v5 = vld [vmem:[%s2795_s20 + $0x20] sm:$0xff]  ;;  %v179_v6 = vld [vmem:[%s2795_s20 + $0x28] sm:$0xff] }
  0x12   : > { %2267 = vmatmul.mubr.msk.f32.vlgmr.msra.gmra.mrb[0].mxu0 %vm198_vm0, %v175_v2  ;;  %v180_v7 = vld [vmem:[%s2795_s20 + $0x30] sm:$0xff]  ;;  %v181_v8 = vld [vmem:[%s2795_s20 + $0x38] sm:$0xff]  ;;  %v182_v9 = vld [vmem:[%s2795_s20 + $0x40] sm:$0xff] }
  0x13   : > { %2269 = vmatprep.mubr.msk.f32.mxu0 %vm198_vm0, %v176_v3  ;;  %v183_v10 = vld [vmem:[%s2795_s20 + $0x48] sm:$0xff]  ;;  %v184_v11 = vld [vmem:[%s2795_s20 + $0x50] sm:$0xff]  ;;  %v185_v12 = vld [vmem:[%s2795_s20 + $0x58] sm:$0xff]  ;;  %2317 = vmatpush3.msra.mxu0 %v2036_v18 }
  0x14   : > { %v186_v13 = vld [vmem:[%s2795_s20 + $0x60] sm:$0xff]  ;;  %v187_v14 = vld [vmem:[%s2795_s20 + $0x68] sm:$0xff]  ;;  %v188_v15 = vld [vmem:[%s2795_s20 + $0x70] sm:$0xff] }
  0x15   : > { %v189_v16 = vld [vmem:[%s2795_s20 + $0x78] sm:$0xff] }
  0x16   : > { %2270 = vmatmul.mubr.msk.f32.gmra.mrb[2].mxu0 %vm198_vm0, %v177_v4 }
  0x17   : > { %2272 = vmatprep.mubr.msk.f32.mxu0 %vm198_vm0, %v178_v5 }
  0x1a   : > { %2273 = vmatmul.mubr.msk.f32.gmra.mrb[4].mxu0 %vm198_vm0, %v179_v6 }
  0x1b   : > { %2275 = vmatprep.mubr.msk.f32.mxu0 %vm198_vm0, %v180_v7 }
  0x1e   : > { %2276 = vmatmul.mubr.msk.f32.gmra.mrb[6].mxu0 %vm198_vm0, %v181_v8 }
  0x1f   : > { %2278 = vmatprep.mubr.msk.f32.mxu0 %vm198_vm0, %v182_v9 }
  0x22   : > { %2279 = vmatmul.mubr.msk.f32.gmra.mrb[8].mxu0 %vm198_vm0, %v183_v10 }
  0x23   : > { %2281 = vmatprep.mubr.msk.f32.mxu0 %vm198_vm0, %v184_v11 }
  0x26   : > { %2282 = vmatmul.mubr.msk.f32.gmra.mrb[10].mxu0 %vm198_vm0, %v185_v12 }
  0x27   : > { %2284 = vmatprep.mubr.msk.f32.mxu0 %vm198_vm0, %v186_v13 }
  0x2a   : > { %2285 = vmatmul.mubr.msk.f32.gmra.mrb[12].mxu0 %vm198_vm0, %v187_v14 }
  0x2b   : > { %2287 = vmatprep.mubr.msk.f32.mxu0 %vm198_vm0, %v188_v15 }
  0x2e   : > { %2288 = vmatmul.mubr.msk.f32.gmra.mrb[14].mxu0 %vm198_vm0, %v189_v16 }
  0xe5   : > { %v2268_v20 = vpop.f32.mrb[0].mxu0 }
  0xe6   : > { %v319_v21 = vadd.f32 %v2268_v20, %v2838_v19  ;;  %v313_v22 = vpop.f32.mrb[1].mxu0 }
  0xe7   : > { %v314_v23 = vadd.f32 %v2838_v19, %v313_v22 }
  0xe8   : > { %v1986_v24 = vmul.f32 -1.442695, %v319_v21 }
  0xe9   : > { %v1985_v25 = vmul.f32 -1.442695, %v314_v23  ;;  %v2271_v26 = vpop.f32.mrb[2].mxu0 }
  0xea   : > { %2428 = vpow2.f32 %v1986_v24  ;;  %v329_v27 = vadd.f32 %v2271_v26, %v2838_v19  ;;  %v323_v28 = vpop.f32.mrb[3].mxu0 }
  0xeb   : > { %2430 = vpow2.f32 %v1985_v25  ;;  %v324_v29 = vadd.f32 %v2838_v19, %v323_v28 }
  0xec   : > { %v1988_v30 = vmul.f32 -1.442695, %v329_v27 }
  0xed   : > { %v1987_v31 = vmul.f32 -1.442695, %v324_v29  ;;  %v2274_v32 = vpop.f32.mrb[4].mxu0 }
  0xee   : > { %2432 = vpow2.f32 %v1988_v30  ;;  %v339_v33 = vadd.f32 %v2274_v32, %v2838_v19  ;;  %v333_v34 = vpop.f32.mrb[5].mxu0 }
  0xef   : > { %2434 = vpow2.f32 %v1987_v31  ;;  %v334_v35 = vadd.f32 %v2838_v19, %v333_v34 }
  0xf0   : > { %v1990_v36 = vmul.f32 -1.442695, %v339_v33 }
  0xf1   : > { %v1989_v37 = vmul.f32 -1.442695, %v334_v35  ;;  %v2277_v38 = vpop.f32.mrb[6].mxu0 }
  0xf2   : > { %2436 = vpow2.f32 %v1990_v36  ;;  %v349_v39 = vadd.f32 %v2277_v38, %v2838_v19  ;;  %v343_v40 = vpop.f32.mrb[7].mxu0 }
  0xf3   : > { %2438 = vpow2.f32 %v1989_v37  ;;  %v344_v41 = vadd.f32 %v2838_v19, %v343_v40 }
  0xf4   : > { %v2429_v42 = vpop.eup %2428  ;;  %v1992_v43 = vmul.f32 -1.442695, %v349_v39 }
  0xf5   : > { %v2431_v44 = vpop.eup %2430  ;;  %v441_v45 = vadd.f32 1.0, %v2429_v42  ;;  %v1991_v46 = vmul.f32 -1.442695, %v344_v41  ;;  %v2280_v47 = vpop.f32.mrb[8].mxu0 }
  0xf6   : > { %v440_v48 = vadd.f32 1.0, %v2431_v44  ;;  %2440 = vpow2.f32 %v1992_v43  ;;  %v359_v49 = vadd.f32 %v2280_v47, %v2838_v19  ;;  %v353_v50 = vpop.f32.mrb[9].mxu0 }
  0xf7   : > { %2442 = vrcp.f32 %v441_v45  ;;  %v354_v51 = vadd.f32 %v2838_v19, %v353_v50 }
  0xf8   : > { %v2433_v52 = vpop.eup %2432  ;;  %2444 = vrcp.f32 %v440_v48  ;;  %v1994_v53 = vmul.f32 -1.442695, %v359_v49 }
  0xf9   : > { %v2435_v54 = vpop.eup %2434  ;;  %v443_v55 = vadd.f32 1.0, %v2433_v52  ;;  %2446 = vpow2.f32 %v1991_v46  ;;  %v1993_v56 = vmul.f32 -1.442695, %v354_v51  ;;  %v2283_v57 = vpop.f32.mrb[10].mxu0  ;;  %v2071_v52 = vld [vmem:[%s3075_s1 + $0x18] sm:$0xff] }
  0xfa   : > { %v442_v58 = vadd.f32 1.0, %v2435_v54  ;;  %2448 = vpow2.f32 %v1994_v53  ;;  %v369_v59 = vadd.f32 %v2283_v57, %v2838_v19  ;;  %v363_v60 = vpop.f32.mrb[11].mxu0  ;;  %2342 = vmatprep.subr.mxu1 %v2071_v52  ;;  %v2878_v53 = vld [vmem:[%s3076_s2 + $0x1] ss:$0 sm:$0xff] }
  0xfb   : > { %2450 = vrcp.f32 %v443_v55  ;;  %v364_v61 = vadd.f32 %v2838_v19, %v363_v60 }
  0xfc   : > { %v2437_v62 = vpop.eup %2436  ;;  %2452 = vrcp.f32 %v442_v58  ;;  %v1996_v63 = vmul.f32 -1.442695, %v369_v59 }
  0xfd   : > { %v2439_v0 = vpop.eup %2438  ;;  %v445_v1 = vadd.f32 1.0, %v2437_v62  ;;  %2454 = vpow2.f32 %v1993_v56  ;;  %v1995_v2 = vmul.f32 -1.442695, %v364_v61  ;;  %v2286_v3 = vpop.f32.mrb[12].mxu0 }
  0xfe   : > { %v444_v4 = vadd.f32 1.0, %v2439_v0  ;;  %2456 = vpow2.f32 %v1996_v63  ;;  %v379_v5 = vadd.f32 %v2286_v3, %v2838_v19  ;;  %v373_v6 = vpop.f32.mrb[13].mxu0 }
  0xff   : > { %2458 = vrcp.f32 %v445_v1  ;;  %v374_v7 = vadd.f32 %v2838_v19, %v373_v6 }
 0x100   : > { %v2441_v8 = vpop.eup %2440  ;;  %2460 = vrcp.f32 %v444_v4  ;;  %v1998_v9 = vmul.f32 -1.442695, %v379_v5 }
 0x101   : > { %v2443_v10 = vpop.eup %2442  ;;  %2462 = vpow2.f32 %v1995_v2  ;;  %v1997_v11 = vmul.f32 -1.442695, %v374_v7  ;;  %v2289_v12 = vpop.f32.mrb[14].mxu0  ;;  %v447_v17 = vadd.f32 1.0, %v2441_v8 }
 0x102   : > { %v2445_v13 = vpop.eup %2444  ;;  %2464 = vpow2.f32 %v1998_v9  ;;  %v389_v14 = vadd.f32 %v2289_v12, %v2838_v19  ;;  %v383_v15 = vpop.f32.mrb[15].mxu0 }
 0x103   : > { %v2447_v16 = vpop.eup %2446  ;;  %v384_v18 = vadd.f32 %v2838_v19, %v383_v15  ;;  %2292 = vmatprep.mubr.msk.f32.mxu1 %vm198_vm0, %v2445_v13  ;;  %2466 = vpow2.f32 %v1997_v11 }
 0x104   : > { %v2449_v20 = vpop.eup %2448  ;;  %v446_v21 = vadd.f32 1.0, %v2447_v16  ;;  %v2000_v22 = vmul.f32 -1.442695, %v389_v14  ;;  %2293 = vmatmul.mubr.msk.f32.vlgmr.msra.gmra.mrb[0].mxu1 %vm198_vm0, %v2443_v10 }
 0x105   : > { %v2451_v23 = vpop.eup %2450  ;;  %v1999_v24 = vmul.f32 -1.442695, %v384_v18  ;;  %v449_v27 = vadd.f32 1.0, %v2449_v20  ;;  %2343 = vmatpush3.msra.mxu1 %v2071_v52 }
 0x106   : > { %v2453_v25 = vpop.eup %2452  ;;  %2468 = vrcp.f32 %v446_v21 }
 0x107   : > { %v2455_v26 = vpop.eup %2454  ;;  %2470 = vrcp.f32 %v447_v17  ;;  %2295 = vmatprep.mubr.msk.f32.mxu1 %vm198_vm0, %v2453_v25 }
 0x108   : > { %v2457_v28 = vpop.eup %2456  ;;  %v448_v29 = vadd.f32 1.0, %v2455_v26  ;;  %2472 = vpow2.f32 %v2000_v22  ;;  %2296 = vmatmul.mubr.msk.f32.gmra.mrb[2].mxu1 %vm198_vm0, %v2451_v23 }
 0x109   : > { %v2459_v19 = vpop.eup %2458  ;;  %2474 = vpow2.f32 %v1999_v24  ;;  %v451_v32 = vadd.f32 1.0, %v2457_v28 }
 0x10a   : > { %v2461_v30 = vpop.eup %2460  ;;  %2476 = vrcp.f32 %v448_v29 }
 0x10b   : > { %v2463_v31 = vpop.eup %2462  ;;  %2478 = vrcp.f32 %v449_v27  ;;  %2298 = vmatprep.mubr.msk.f32.mxu1 %vm198_vm0, %v2461_v30 }
 0x10c   : > { %v2465_v33 = vpop.eup %2464  ;;  %v450_v34 = vadd.f32 1.0, %v2463_v31  ;;  %2299 = vmatmul.mubr.msk.f32.gmra.mrb[4].mxu1 %vm198_vm0, %v2459_v19 }
 0x10d   : > { %v2467_v35 = vpop.eup %2466  ;;  %v453_v36 = vadd.f32 1.0, %v2465_v33 }
 0x10e   : > { %2480 = vrcp.f32 %v450_v34  ;;  %v452_v37 = vadd.f32 1.0, %v2467_v35 }
 0x10f   : > { %2482 = vrcp.f32 %v451_v32 }
 0x110   : > { %v2469_v38 = vpop.eup %2468  ;;  %2484 = vrcp.f32 %v452_v37 }
 0x111   : > { %v2471_v39 = vpop.eup %2470  ;;  %2301 = vmatprep.mubr.msk.f32.mxu1 %vm198_vm0, %v2469_v38  ;;  %2486 = vrcp.f32 %v453_v36 }
 0x112   : > { %v2473_v40 = vpop.eup %2472  ;;  %2302 = vmatmul.mubr.msk.f32.gmra.mrb[6].mxu1 %vm198_vm0, %v2471_v39 }
 0x113   : > { %v2475_v41 = vpop.eup %2474  ;;  %v455_v42 = vadd.f32 1.0, %v2473_v40 }
 0x114   : > { %v2477_v43 = vpop.eup %2476  ;;  %v454_v44 = vadd.f32 1.0, %v2475_v41 }
 0x115   : > { %v2479_v45 = vpop.eup %2478  ;;  %2304 = vmatprep.mubr.msk.f32.mxu1 %vm198_vm0, %v2477_v43 }
 0x116   : > { %2488 = vrcp.f32 %v454_v44  ;;  %2305 = vmatmul.mubr.msk.f32.gmra.mrb[8].mxu1 %vm198_vm0, %v2479_v45 }
 0x117   : > { %2490 = vrcp.f32 %v455_v42 }
 0x118   : > { %v2481_v46 = vpop.eup %2480 }
 0x119   : > { %v2483_v47 = vpop.eup %2482  ;;  %2307 = vmatprep.mubr.msk.f32.mxu1 %vm198_vm0, %v2481_v46 }
 0x11a   : > { %2308 = vmatmul.mubr.msk.f32.gmra.mrb[10].mxu1 %vm198_vm0, %v2483_v47  ;;  %v2485_v48 = vpop.eup %2484 }
 0x11b   : > { %2310 = vmatprep.mubr.msk.f32.mxu1 %vm198_vm0, %v2485_v48  ;;  %v2487_v49 = vpop.eup %2486 }
 0x11e   : > { %2311 = vmatmul.mubr.msk.f32.gmra.mrb[12].mxu1 %vm198_vm0, %v2487_v49 }
 0x120   : > { %v2489_v50 = vpop.eup %2488 }
 0x121   : > { %v2491_v51 = vpop.eup %2490  ;;  %2313 = vmatprep.mubr.msk.f32.mxu1 %vm198_vm0, %v2489_v50 }
 0x122   : > { %2314 = vmatmul.mubr.msk.f32.gmra.mrb[14].mxu1 %vm198_vm0, %v2491_v51 }
 0x1d7   : > { %v2294_v54 = vpop.f32.mrb[0].mxu1 }
 0x1d8   : > { %v618_v55 = vadd.f32 %v2294_v54, %v2878_v53  ;;  %v612_v56 = vpop.f32.mrb[1].mxu1 }
 0x1d9   : > { %v613_v57 = vadd.f32 %v2878_v53, %v612_v56 }
 0x1da   : > { %v2021_v58 = vmul.f32 -1.442695, %v618_v55 }
 0x1db   : > { %v2020_v59 = vmul.f32 -1.442695, %v613_v57  ;;  %v2297_v60 = vpop.f32.mrb[2].mxu1 }
 0x1dc   : > { %2492 = vpow2.f32 %v2021_v58  ;;  %v628_v61 = vadd.f32 %v2297_v60, %v2878_v53  ;;  %v622_v62 = vpop.f32.mrb[3].mxu1 }
 0x1dd   : > { %2494 = vpow2.f32 %v2020_v59  ;;  %v623_v63 = vadd.f32 %v2878_v53, %v622_v62 }
 0x1de   : > { %v2023_v0 = vmul.f32 -1.442695, %v628_v61 }
 0x1df   : > { %v2022_v1 = vmul.f32 -1.442695, %v623_v63  ;;  %v2300_v2 = vpop.f32.mrb[4].mxu1 }
 0x1e0   : > { %2496 = vpow2.f32 %v2023_v0  ;;  %v638_v3 = vadd.f32 %v2300_v2, %v2878_v53  ;;  %v632_v4 = vpop.f32.mrb[5].mxu1 }
 0x1e1   : > { %2498 = vpow2.f32 %v2022_v1  ;;  %v633_v5 = vadd.f32 %v2878_v53, %v632_v4 }
 0x1e2   : > { %v2025_v6 = vmul.f32 -1.442695, %v638_v3 }
 0x1e3   : > { %v2024_v7 = vmul.f32 -1.442695, %v633_v5 }
 0x1e4   : > { %2500 = vpow2.f32 %v2025_v6 }
 0x1e5   : > { %2502 = vpow2.f32 %v2024_v7  ;;  %v2303_v8 = vpop.f32.mrb[6].mxu1 }
 0x1e6   : > { %v2493_v9 = vpop.eup %2492  ;;  %v648_v10 = vadd.f32 %v2303_v8, %v2878_v53  ;;  %v642_v11 = vpop.f32.mrb[7].mxu1 }
 0x1e7   : > { %v2495_v12 = vpop.eup %2494  ;;  %v740_v13 = vadd.f32 1.0, %v2493_v9  ;;  %v643_v14 = vadd.f32 %v2878_v53, %v642_v11 }
 0x1e8   : > { %v739_v15 = vadd.f32 1.0, %v2495_v12  ;;  %v2027_v16 = vmul.f32 -1.442695, %v648_v10 }
 0x1e9   : > { %2504 = vrcp.f32 %v740_v13  ;;  %v2026_v17 = vmul.f32 -1.442695, %v643_v14  ;;  %v2306_v18 = vpop.f32.mrb[8].mxu1 }
 0x1ea   : > { %v2497_v20 = vpop.eup %2496  ;;  %2506 = vrcp.f32 %v739_v15  ;;  %v658_v21 = vadd.f32 %v2306_v18, %v2878_v53  ;;  %v652_v22 = vpop.f32.mrb[9].mxu1 }
 0x1eb   : > { %v2499_v23 = vpop.eup %2498  ;;  %v742_v24 = vadd.f32 1.0, %v2497_v20  ;;  %2508 = vpow2.f32 %v2027_v16  ;;  %v653_v25 = vadd.f32 %v2878_v53, %v652_v22 }
 0x1ec   : > { %v741_v26 = vadd.f32 1.0, %v2499_v23  ;;  %2510 = vpow2.f32 %v2026_v17  ;;  %v2029_v27 = vmul.f32 -1.442695, %v658_v21  ;;  %v2106_v23 = vld [vmem:[%s3075_s1 + $0x20] sm:$0xff] }
 0x1ed   : > { %2512 = vrcp.f32 %v742_v24  ;;  %v2028_v28 = vmul.f32 -1.442695, %v653_v25  ;;  %v2309_v29 = vpop.f32.mrb[10].mxu1  ;;  %2368 = vmatprep.subr.mxu0 %v2106_v23  ;;  %v2918_v24 = vld [vmem:[%s3076_s2 + $0x2] ss:$0 sm:$0xff] }
 0x1ee   : > { %v2501_v19 = vpop.eup %2500  ;;  %2514 = vrcp.f32 %v741_v26  ;;  %v668_v30 = vadd.f32 %v2309_v29, %v2878_v53  ;;  %v662_v31 = vpop.f32.mrb[11].mxu1 }
 0x1ef   : > { %v2503_v32 = vpop.eup %2502  ;;  %v744_v33 = vadd.f32 1.0, %v2501_v19  ;;  %2516 = vpow2.f32 %v2029_v27  ;;  %v663_v34 = vadd.f32 %v2878_v53, %v662_v31 }
 0x1f0   : > { %v743_v35 = vadd.f32 1.0, %v2503_v32  ;;  %2518 = vpow2.f32 %v2028_v28  ;;  %v2031_v36 = vmul.f32 -1.442695, %v668_v30 }
 0x1f1   : > { %2520 = vrcp.f32 %v744_v33  ;;  %v2030_v37 = vmul.f32 -1.442695, %v663_v34  ;;  %v2312_v38 = vpop.f32.mrb[12].mxu1 }
 0x1f2   : > { %2522 = vrcp.f32 %v743_v35  ;;  %v678_v39 = vadd.f32 %v2312_v38, %v2878_v53  ;;  %v672_v40 = vpop.f32.mrb[13].mxu1 }
 0x1f3   : > { %v2505_v41 = vpop.eup %2504  ;;  %2524 = vpow2.f32 %v2031_v36  ;;  %v673_v42 = vadd.f32 %v2878_v53, %v672_v40 }
 0x1f4   : > { %v2507_v43 = vpop.eup %2506  ;;  %2526 = vpow2.f32 %v2030_v37  ;;  %v2033_v44 = vmul.f32 -1.442695, %v678_v39 }
 0x1f5   : > { %v2509_v45 = vpop.eup %2508  ;;  %v2032_v46 = vmul.f32 -1.442695, %v673_v42  ;;  %v2315_v47 = vpop.f32.mrb[14].mxu1  ;;  %2318 = vmatprep.mubr.msk.f32.mxu0 %vm198_vm0, %v2507_v43 }
 0x1f6   : > { %v2511_v48 = vpop.eup %2510  ;;  %v746_v49 = vadd.f32 1.0, %v2509_v45  ;;  %2528 = vpow2.f32 %v2033_v44  ;;  %v688_v50 = vadd.f32 %v2315_v47, %v2878_v53  ;;  %v682_v51 = vpop.f32.mrb[15].mxu1  ;;  %2319 = vmatmul.mubr.msk.f32.vlgmr.msra.gmra.mrb[16].mxu0 %vm198_vm0, %v2505_v41 }
 0x1f7   : > { %v2513_v52 = vpop.eup %2512  ;;  %v745_v54 = vadd.f32 1.0, %v2511_v48  ;;  %2530 = vpow2.f32 %v2032_v46  ;;  %v683_v55 = vadd.f32 %v2878_v53, %v682_v51  ;;  %2369 = vmatpush3.msra.mxu0 %v2106_v23 }
 0x1f8   : > { %v2515_v56 = vpop.eup %2514  ;;  %2532 = vrcp.f32 %v746_v49  ;;  %v2035_v57 = vmul.f32 -1.442695, %v688_v50 }
 0x1f9   : > { %v2517_v58 = vpop.eup %2516  ;;  %2534 = vrcp.f32 %v745_v54  ;;  %v2034_v59 = vmul.f32 -1.442695, %v683_v55  ;;  %2321 = vmatprep.mubr.msk.f32.mxu0 %vm198_vm0, %v2515_v56 }
 0x1fa   : > { %v2519_v60 = vpop.eup %2518  ;;  %v748_v61 = vadd.f32 1.0, %v2517_v58  ;;  %2536 = vpow2.f32 %v2035_v57  ;;  %2322 = vmatmul.mubr.msk.f32.gmra.mrb[18].mxu0 %vm198_vm0, %v2513_v52 }
 0x1fb   : > { %v2521_v62 = vpop.eup %2520  ;;  %v747_v63 = vadd.f32 1.0, %v2519_v60  ;;  %2538 = vpow2.f32 %v2034_v59 }
 0x1fc   : > { %v2523_v0 = vpop.eup %2522 }
 0x1fd   : > { %v2525_v1 = vpop.eup %2524  ;;  %2540 = vrcp.f32 %v747_v63  ;;  %2324 = vmatprep.mubr.msk.f32.mxu0 %vm198_vm0, %v2523_v0 }
 0x1fe   : > { %v2527_v53 = vpop.eup %2526  ;;  %2542 = vrcp.f32 %v748_v61  ;;  %v750_v2 = vadd.f32 1.0, %v2525_v1  ;;  %2325 = vmatmul.mubr.msk.f32.gmra.mrb[20].mxu0 %vm198_vm0, %v2521_v62 }
 0x1ff   : > { %v749_v3 = vadd.f32 1.0, %v2527_v53 }
 0x200   : > { %v2529_v4 = vpop.eup %2528 }
 0x201   : > { %v2531_v5 = vpop.eup %2530  ;;  %2544 = vrcp.f32 %v749_v3  ;;  %v752_v7 = vadd.f32 1.0, %v2529_v4 }
 0x202   : > { %v2533_v6 = vpop.eup %2532  ;;  %2546 = vrcp.f32 %v750_v2  ;;  %v751_v8 = vadd.f32 1.0, %v2531_v5 }
 0x203   : > { %v2535_v9 = vpop.eup %2534 }
 0x204   : > { %v2537_v10 = vpop.eup %2536  ;;  %2548 = vrcp.f32 %v751_v8  ;;  %2327 = vmatprep.mubr.msk.f32.mxu0 %vm198_vm0, %v2535_v9 }
 0x205   : > { %v2539_v11 = vpop.eup %2538  ;;  %2328 = vmatmul.mubr.msk.f32.gmra.mrb[22].mxu0 %vm198_vm0, %v2533_v6  ;;  %2550 = vrcp.f32 %v752_v7  ;;  %v754_v12 = vadd.f32 1.0, %v2537_v10 }
 0x206   : > { %v753_v13 = vadd.f32 1.0, %v2539_v11 }
 0x207   : > { %v2541_v14 = vpop.eup %2540 }
 0x208   : > { %v2543_v15 = vpop.eup %2542  ;;  %2552 = vrcp.f32 %v753_v13  ;;  %2330 = vmatprep.mubr.msk.f32.mxu0 %vm198_vm0, %v2541_v14 }
 0x209   : > { %2331 = vmatmul.mubr.msk.f32.gmra.mrb[24].mxu0 %vm198_vm0, %v2543_v15  ;;  %2554 = vrcp.f32 %v754_v12 }
 0x20b   : > { %v2545_v16 = vpop.eup %2544 }
 0x20c   : > { %v2547_v17 = vpop.eup %2546  ;;  %2333 = vmatprep.mubr.msk.f32.mxu0 %vm198_vm0, %v2545_v16 }
 0x20d   : > { %2334 = vmatmul.mubr.msk.f32.gmra.mrb[26].mxu0 %vm198_vm0, %v2547_v17 }
 0x20e   : > { %v2549_v18 = vpop.eup %2548 }
 0x20f   : > { %2336 = vmatprep.mubr.msk.f32.mxu0 %vm198_vm0, %v2549_v18  ;;  %v2551_v20 = vpop.eup %2550 }
 0x211   : > { %2337 = vmatmul.mubr.msk.f32.gmra.mrb[28].mxu0 %vm198_vm0, %v2551_v20 }
 0x212   : > { %v2553_v21 = vpop.eup %2552 }
 0x213   : > { %2339 = vmatprep.mubr.msk.f32.mxu0 %vm198_vm0, %v2553_v21  ;;  %v2555_v22 = vpop.eup %2554 }
 0x215   : > { %2340 = vmatmul.mubr.msk.f32.gmra.mrb[30].mxu0 %vm198_vm0, %v2555_v22 }
 0x2c9   : > { %v2320_v25 = vpop.f32.mrb[16].mxu0 }
 0x2ca   : > { %v917_v26 = vadd.f32 %v2320_v25, %v2918_v24  ;;  %v911_v27 = vpop.f32.mrb[17].mxu0 }
 0x2cb   : > { %v912_v28 = vadd.f32 %v2918_v24, %v911_v27 }
 0x2cc   : > { %v2056_v29 = vmul.f32 -1.442695, %v917_v26 }
 0x2cd   : > { %v2055_v19 = vmul.f32 -1.442695, %v912_v28  ;;  %v2323_v30 = vpop.f32.mrb[18].mxu0 }
 0x2ce   : > { %2556 = vpow2.f32 %v2056_v29  ;;  %v927_v31 = vadd.f32 %v2323_v30, %v2918_v24  ;;  %v921_v32 = vpop.f32.mrb[19].mxu0 }
 0x2cf   : > { %2558 = vpow2.f32 %v2055_v19  ;;  %v922_v33 = vadd.f32 %v2918_v24, %v921_v32 }
 0x2d0   : > { %v2058_v34 = vmul.f32 -1.442695, %v927_v31 }
 0x2d1   : > { %v2057_v35 = vmul.f32 -1.442695, %v922_v33  ;;  %v2326_v36 = vpop.f32.mrb[20].mxu0 }
 0x2d2   : > { %2560 = vpow2.f32 %v2058_v34  ;;  %v937_v37 = vadd.f32 %v2326_v36, %v2918_v24  ;;  %v931_v38 = vpop.f32.mrb[21].mxu0 }
 0x2d3   : > { %2562 = vpow2.f32 %v2057_v35  ;;  %v932_v39 = vadd.f32 %v2918_v24, %v931_v38 }
 0x2d4   : > { %v2060_v40 = vmul.f32 -1.442695, %v937_v37 }
 0x2d5   : > { %v2059_v41 = vmul.f32 -1.442695, %v932_v39 }
 0x2d6   : > { %2564 = vpow2.f32 %v2060_v40 }
 0x2d7   : > { %2566 = vpow2.f32 %v2059_v41 }
 0x2d8   : > { %v2557_v42 = vpop.eup %2556  ;;  %v2329_v43 = vpop.f32.mrb[22].mxu0 }
 0x2d9   : > { %v2559_v44 = vpop.eup %2558  ;;  %v1039_v45 = vadd.f32 1.0, %v2557_v42  ;;  %v947_v46 = vadd.f32 %v2329_v43, %v2918_v24  ;;  %v941_v47 = vpop.f32.mrb[23].mxu0 }
 0x2da   : > { %v1038_v48 = vadd.f32 1.0, %v2559_v44  ;;  %v942_v49 = vadd.f32 %v2918_v24, %v941_v47 }
 0x2db   : > { %2568 = vrcp.f32 %v1039_v45  ;;  %v2062_v50 = vmul.f32 -1.442695, %v947_v46 }
 0x2dc   : > { %v2561_v51 = vpop.eup %2560  ;;  %2570 = vrcp.f32 %v1038_v48  ;;  %v2061_v52 = vmul.f32 -1.442695, %v942_v49  ;;  %v2332_v54 = vpop.f32.mrb[24].mxu0 }
 0x2dd   : > { %v2563_v55 = vpop.eup %2562  ;;  %v1041_v56 = vadd.f32 1.0, %v2561_v51  ;;  %2572 = vpow2.f32 %v2062_v50  ;;  %v957_v57 = vadd.f32 %v2332_v54, %v2918_v24  ;;  %v951_v58 = vpop.f32.mrb[25].mxu0 }
 0x2de   : > { %v1040_v59 = vadd.f32 1.0, %v2563_v55  ;;  %2574 = vpow2.f32 %v2061_v52  ;;  %v952_v60 = vadd.f32 %v2918_v24, %v951_v58  ;;  %v2958_v58 = vld [vmem:[%s3076_s2 + $0x3] ss:$0 sm:$0xff] }
 0x2df   : > { %2576 = vrcp.f32 %v1041_v56  ;;  %v2064_v61 = vmul.f32 -1.442695, %v957_v57  ;;  %v2141_v57 = vld [vmem:[%s3075_s1 + $0x28] sm:$0xff] }
 0x2e0   : > { %v2565_v62 = vpop.eup %2564  ;;  %2578 = vrcp.f32 %v1040_v59  ;;  %v2063_v63 = vmul.f32 -1.442695, %v952_v60  ;;  %v2335_v0 = vpop.f32.mrb[26].mxu0  ;;  %2394 = vmatprep.subr.mxu1 %v2141_v57 }
 0x2e1   : > { %v2567_v1 = vpop.eup %2566  ;;  %v1043_v53 = vadd.f32 1.0, %v2565_v62  ;;  %2580 = vpow2.f32 %v2064_v61  ;;  %v967_v2 = vadd.f32 %v2335_v0, %v2918_v24  ;;  %v961_v3 = vpop.f32.mrb[27].mxu0 }
 0x2e2   : > { %v1042_v4 = vadd.f32 1.0, %v2567_v1  ;;  %2582 = vpow2.f32 %v2063_v63  ;;  %v962_v5 = vadd.f32 %v2918_v24, %v961_v3 }
 0x2e3   : > { %2584 = vrcp.f32 %v1043_v53  ;;  %v2066_v6 = vmul.f32 -1.442695, %v967_v2 }
 0x2e4   : > { %2586 = vrcp.f32 %v1042_v4  ;;  %v2065_v7 = vmul.f32 -1.442695, %v962_v5  ;;  %v2338_v8 = vpop.f32.mrb[28].mxu0 }
 0x2e5   : > { %v2569_v9 = vpop.eup %2568  ;;  %2588 = vpow2.f32 %v2066_v6  ;;  %v977_v10 = vadd.f32 %v2338_v8, %v2918_v24  ;;  %v971_v11 = vpop.f32.mrb[29].mxu0 }
 0x2e6   : > { %v2571_v12 = vpop.eup %2570  ;;  %2590 = vpow2.f32 %v2065_v7  ;;  %v972_v13 = vadd.f32 %v2918_v24, %v971_v11 }
 0x2e7   : > { %v2573_v14 = vpop.eup %2572  ;;  %v2068_v15 = vmul.f32 -1.442695, %v977_v10  ;;  %2344 = vmatprep.mubr.msk.f32.mxu1 %vm198_vm0, %v2571_v12 }
 0x2e8   : > { %v2575_v16 = vpop.eup %2574  ;;  %v1045_v17 = vadd.f32 1.0, %v2573_v14  ;;  %v2067_v18 = vmul.f32 -1.442695, %v972_v13  ;;  %v2341_v20 = vpop.f32.mrb[30].mxu0  ;;  %2345 = vmatmul.mubr.msk.f32.vlgmr.msra.gmra.mrb[16].mxu1 %vm198_vm0, %v2569_v9 }
 0x2e9   : > { %v2577_v21 = vpop.eup %2576  ;;  %v1044_v22 = vadd.f32 1.0, %v2575_v16  ;;  %2592 = vpow2.f32 %v2068_v15  ;;  %v987_v23 = vadd.f32 %v2341_v20, %v2918_v24  ;;  %v981_v25 = vpop.f32.mrb[31].mxu0  ;;  %2395 = vmatpush3.msra.mxu1 %v2141_v57 }
 0x2ea   : > { %v2579_v26 = vpop.eup %2578  ;;  %2594 = vrcp.f32 %v1045_v17  ;;  %v982_v27 = vadd.f32 %v2918_v24, %v981_v25 }
 0x2eb   : > { %v2581_v28 = vpop.eup %2580  ;;  %2596 = vrcp.f32 %v1044_v22  ;;  %v2070_v29 = vmul.f32 -1.442695, %v987_v23  ;;  %2347 = vmatprep.mubr.msk.f32.mxu1 %vm198_vm0, %v2579_v26 }
 0x2ec   : > { %v2583_v19 = vpop.eup %2582  ;;  %v1047_v30 = vadd.f32 1.0, %v2581_v28  ;;  %2598 = vpow2.f32 %v2067_v18  ;;  %v2069_v31 = vmul.f32 -1.442695, %v982_v27  ;;  %2348 = vmatmul.mubr.msk.f32.gmra.mrb[18].mxu1 %vm198_vm0, %v2577_v21 }
 0x2ed   : > { %v2585_v32 = vpop.eup %2584  ;;  %v1046_v33 = vadd.f32 1.0, %v2583_v19  ;;  %2600 = vpow2.f32 %v2070_v29 }
 0x2ee   : > { %v2587_v34 = vpop.eup %2586  ;;  %2602 = vrcp.f32 %v1047_v30 }
 0x2ef   : > { %v2589_v35 = vpop.eup %2588  ;;  %2604 = vrcp.f32 %v1046_v33  ;;  %2350 = vmatprep.mubr.msk.f32.mxu1 %vm198_vm0, %v2587_v34 }
 0x2f0   : > { %v2591_v24 = vpop.eup %2590  ;;  %v1049_v36 = vadd.f32 1.0, %v2589_v35  ;;  %2606 = vpow2.f32 %v2069_v31  ;;  %2351 = vmatmul.mubr.msk.f32.gmra.mrb[20].mxu1 %vm198_vm0, %v2585_v32 }
 0x2f1   : > { %v1048_v37 = vadd.f32 1.0, %v2591_v24 }
 0x2f3   : > { %v2593_v38 = vpop.eup %2592  ;;  %2608 = vrcp.f32 %v1048_v37 }
 0x2f4   : > { %v2595_v39 = vpop.eup %2594  ;;  %2610 = vrcp.f32 %v1049_v36  ;;  %v1051_v42 = vadd.f32 1.0, %v2593_v38 }
 0x2f5   : > { %v2597_v40 = vpop.eup %2596 }
 0x2f6   : > { %v2599_v41 = vpop.eup %2598  ;;  %2353 = vmatprep.mubr.msk.f32.mxu1 %vm198_vm0, %v2597_v40 }
 0x2f7   : > { %v2601_v43 = vpop.eup %2600  ;;  %v1050_v44 = vadd.f32 1.0, %v2599_v41  ;;  %2354 = vmatmul.mubr.msk.f32.gmra.mrb[22].mxu1 %vm198_vm0, %v2595_v39 }
 0x2f8   : > { %v2603_v45 = vpop.eup %2602  ;;  %v1053_v48 = vadd.f32 1.0, %v2601_v43 }
 0x2f9   : > { %v2605_v46 = vpop.eup %2604  ;;  %2612 = vrcp.f32 %v1050_v44 }
 0x2fa   : > { %v2607_v47 = vpop.eup %2606  ;;  %2614 = vrcp.f32 %v1051_v42  ;;  %2356 = vmatprep.mubr.msk.f32.mxu1 %vm198_vm0, %v2605_v46 }
 0x2fb   : > { %v1052_v49 = vadd.f32 1.0, %v2607_v47  ;;  %2357 = vmatmul.mubr.msk.f32.gmra.mrb[24].mxu1 %vm198_vm0, %v2603_v45 }
 0x2fd   : > { %v2609_v50 = vpop.eup %2608  ;;  %2616 = vrcp.f32 %v1052_v49 }
 0x2fe   : > { %v2611_v51 = vpop.eup %2610  ;;  %2618 = vrcp.f32 %v1053_v48  ;;  %2359 = vmatprep.mubr.msk.f32.mxu1 %vm198_vm0, %v2609_v50 }
 0x2ff   : > { %2360 = vmatmul.mubr.msk.f32.gmra.mrb[26].mxu1 %vm198_vm0, %v2611_v51 }
 0x303   : > { %v2613_v52 = vpop.eup %2612 }
 0x304   : > { %v2615_v54 = vpop.eup %2614  ;;  %2362 = vmatprep.mubr.msk.f32.mxu1 %vm198_vm0, %v2613_v52 }
 0x305   : > { %2363 = vmatmul.mubr.msk.f32.gmra.mrb[28].mxu1 %vm198_vm0, %v2615_v54 }
 0x307   : > { %v2617_v55 = vpop.eup %2616 }
 0x308   : > { %v2619_v56 = vpop.eup %2618  ;;  %2365 = vmatprep.mubr.msk.f32.mxu1 %vm198_vm0, %v2617_v55 }
 0x309   : > { %2366 = vmatmul.mubr.msk.f32.gmra.mrb[30].mxu1 %vm198_vm0, %v2619_v56 }
 0x3bb   : > { %v2346_v59 = vpop.f32.mrb[16].mxu1 }
 0x3bc   : > { %v1216_v60 = vadd.f32 %v2346_v59, %v2958_v58  ;;  %v1210_v61 = vpop.f32.mrb[17].mxu1 }
 0x3bd   : > { %v1211_v62 = vadd.f32 %v2958_v58, %v1210_v61 }
 0x3be   : > { %v2091_v63 = vmul.f32 -1.442695, %v1216_v60 }
 0x3bf   : > { %v2090_v0 = vmul.f32 -1.442695, %v1211_v62  ;;  %v2349_v1 = vpop.f32.mrb[18].mxu1 }
 0x3c0   : > { %2620 = vpow2.f32 %v2091_v63  ;;  %v1226_v53 = vadd.f32 %v2349_v1, %v2958_v58  ;;  %v1220_v2 = vpop.f32.mrb[19].mxu1 }
 0x3c1   : > { %2622 = vpow2.f32 %v2090_v0  ;;  %v1221_v3 = vadd.f32 %v2958_v58, %v1220_v2 }
 0x3c2   : > { %v2093_v4 = vmul.f32 -1.442695, %v1226_v53 }
 0x3c3   : > { %v2092_v5 = vmul.f32 -1.442695, %v1221_v3  ;;  %v2352_v6 = vpop.f32.mrb[20].mxu1 }
 0x3c4   : > { %2624 = vpow2.f32 %v2093_v4  ;;  %v1236_v7 = vadd.f32 %v2352_v6, %v2958_v58  ;;  %v1230_v8 = vpop.f32.mrb[21].mxu1 }
 0x3c5   : > { %2626 = vpow2.f32 %v2092_v5  ;;  %v1231_v9 = vadd.f32 %v2958_v58, %v1230_v8 }
 0x3c6   : > { %v2095_v10 = vmul.f32 -1.442695, %v1236_v7 }
 0x3c7   : > { %v2094_v11 = vmul.f32 -1.442695, %v1231_v9 }
 0x3c8   : > { %2628 = vpow2.f32 %v2095_v10 }
 0x3c9   : > { %2630 = vpow2.f32 %v2094_v11 }
 0x3ca   : > { %v2621_v12 = vpop.eup %2620  ;;  %v2355_v13 = vpop.f32.mrb[22].mxu1 }
 0x3cb   : > { %v2623_v14 = vpop.eup %2622  ;;  %v1338_v15 = vadd.f32 1.0, %v2621_v12  ;;  %v1246_v16 = vadd.f32 %v2355_v13, %v2958_v58  ;;  %v1240_v17 = vpop.f32.mrb[23].mxu1 }
 0x3cc   : > { %v1337_v18 = vadd.f32 1.0, %v2623_v14  ;;  %v1241_v20 = vadd.f32 %v2958_v58, %v1240_v17 }
 0x3cd   : > { %2632 = vrcp.f32 %v1338_v15  ;;  %v2097_v21 = vmul.f32 -1.442695, %v1246_v16 }
 0x3ce   : > { %v2625_v22 = vpop.eup %2624  ;;  %2634 = vrcp.f32 %v1337_v18  ;;  %v2096_v23 = vmul.f32 -1.442695, %v1241_v20  ;;  %v2358_v25 = vpop.f32.mrb[24].mxu1 }
 0x3cf   : > { %v2627_v26 = vpop.eup %2626  ;;  %v1340_v27 = vadd.f32 1.0, %v2625_v22  ;;  %2636 = vpow2.f32 %v2097_v21  ;;  %v1256_v28 = vadd.f32 %v2358_v25, %v2958_v58  ;;  %v1250_v29 = vpop.f32.mrb[25].mxu1 }
 0x3d0   : > { %v1339_v19 = vadd.f32 1.0, %v2627_v26  ;;  %2638 = vpow2.f32 %v2096_v23  ;;  %v1251_v30 = vadd.f32 %v2958_v58, %v1250_v29 }
 0x3d1   : > { %2640 = vrcp.f32 %v1340_v27  ;;  %v2099_v31 = vmul.f32 -1.442695, %v1256_v28  ;;  %v2995_v28 = vld [vmem:[%s3076_s2 + $0x4] ss:$0 sm:$0xff] }
 0x3d2   : > { %v2629_v32 = vpop.eup %2628  ;;  %2642 = vrcp.f32 %v1339_v19  ;;  %v2098_v33 = vmul.f32 -1.442695, %v1251_v30  ;;  %v2361_v34 = vpop.f32.mrb[26].mxu1 }
 0x3d3   : > { %v2631_v35 = vpop.eup %2630  ;;  %v1342_v24 = vadd.f32 1.0, %v2629_v32  ;;  %2644 = vpow2.f32 %v2099_v31  ;;  %v1266_v36 = vadd.f32 %v2361_v34, %v2958_v58  ;;  %v1260_v37 = vpop.f32.mrb[27].mxu1 }
 0x3d4   : > { %v1341_v38 = vadd.f32 1.0, %v2631_v35  ;;  %2646 = vpow2.f32 %v2098_v33  ;;  %v1261_v39 = vadd.f32 %v2958_v58, %v1260_v37 }
 0x3d5   : > { %2648 = vrcp.f32 %v1342_v24  ;;  %v2101_v40 = vmul.f32 -1.442695, %v1266_v36 }
 0x3d6   : > { %2650 = vrcp.f32 %v1341_v38  ;;  %v2100_v41 = vmul.f32 -1.442695, %v1261_v39 }
 0x3d7   : > { %v2633_v42 = vpop.eup %2632  ;;  %2652 = vpow2.f32 %v2101_v40 }
 0x3d8   : > { %v2635_v43 = vpop.eup %2634  ;;  %2654 = vpow2.f32 %v2100_v41  ;;  %v2364_v44 = vpop.f32.mrb[28].mxu1 }
 0x3d9   : > { %v2637_v45 = vpop.eup %2636  ;;  %v1276_v46 = vadd.f32 %v2364_v44, %v2958_v58  ;;  %v1270_v47 = vpop.f32.mrb[29].mxu1  ;;  %2370 = vmatprep.mubr.msk.f32.mxu0 %vm198_vm0, %v2635_v43 }
 0x3da   : > { %v2639_v48 = vpop.eup %2638  ;;  %v1344_v49 = vadd.f32 1.0, %v2637_v45  ;;  %v1271_v50 = vadd.f32 %v2958_v58, %v1270_v47  ;;  %2371 = vmatmul.mubr.msk.f32.vlgmr.msra.gmra.mrb[32].mxu0 %vm198_vm0, %v2633_v42 }
 0x3db   : > { %v2641_v51 = vpop.eup %2640  ;;  %v1343_v52 = vadd.f32 1.0, %v2639_v48  ;;  %v2103_v54 = vmul.f32 -1.442695, %v1276_v46 }
 0x3dc   : > { %v2643_v55 = vpop.eup %2642  ;;  %2656 = vrcp.f32 %v1344_v49  ;;  %v2102_v56 = vmul.f32 -1.442695, %v1271_v50  ;;  %v2367_v57 = vpop.f32.mrb[30].mxu1 }
 0x3dd   : > { %v2645_v59 = vpop.eup %2644  ;;  %2658 = vrcp.f32 %v1343_v52  ;;  %v1286_v60 = vadd.f32 %v2367_v57, %v2958_v58  ;;  %v1280_v61 = vpop.f32.mrb[31].mxu1  ;;  %2373 = vmatprep.mubr.msk.f32.mxu0 %vm198_vm0, %v2643_v55 }
 0x3de   : > { %v2647_v62 = vpop.eup %2646  ;;  %v1346_v63 = vadd.f32 1.0, %v2645_v59  ;;  %2660 = vpow2.f32 %v2103_v54  ;;  %v1281_v0 = vadd.f32 %v2958_v58, %v1280_v61  ;;  %2374 = vmatmul.mubr.msk.f32.gmra.mrb[34].mxu0 %vm198_vm0, %v2641_v51 }
 0x3df   : > { %v2649_v1 = vpop.eup %2648  ;;  %v1345_v53 = vadd.f32 1.0, %v2647_v62  ;;  %2662 = vpow2.f32 %v2102_v56  ;;  %v2105_v2 = vmul.f32 -1.442695, %v1286_v60 }
 0x3e0   : > { %v2651_v3 = vpop.eup %2650  ;;  %2664 = vrcp.f32 %v1346_v63  ;;  %v2104_v4 = vmul.f32 -1.442695, %v1281_v0 }
 0x3e1   : > { %v2653_v5 = vpop.eup %2652  ;;  %2666 = vrcp.f32 %v1345_v53  ;;  %2376 = vmatprep.mubr.msk.f32.mxu0 %vm198_vm0, %v2651_v3 }
 0x3e2   : > { %v2655_v6 = vpop.eup %2654  ;;  %v1348_v7 = vadd.f32 1.0, %v2653_v5  ;;  %2668 = vpow2.f32 %v2105_v2  ;;  %2377 = vmatmul.mubr.msk.f32.gmra.mrb[36].mxu0 %vm198_vm0, %v2649_v1 }
 0x3e3   : > { %v1347_v8 = vadd.f32 1.0, %v2655_v6  ;;  %2670 = vpow2.f32 %v2104_v4 }
 0x3e5   : > { %2672 = vrcp.f32 %v1347_v8 }
 0x3e6   : > { %v2657_v58 = vpop.eup %2656  ;;  %2674 = vrcp.f32 %v1348_v7 }
 0x3e7   : > { %v2659_v9 = vpop.eup %2658 }
 0x3e8   : > { %v2661_v10 = vpop.eup %2660  ;;  %2379 = vmatprep.mubr.msk.f32.mxu0 %vm198_vm0, %v2659_v9 }
 0x3e9   : > { %v2663_v11 = vpop.eup %2662  ;;  %v1350_v12 = vadd.f32 1.0, %v2661_v10  ;;  %2380 = vmatmul.mubr.msk.f32.gmra.mrb[38].mxu0 %vm198_vm0, %v2657_v58 }
 0x3ea   : > { %v2665_v13 = vpop.eup %2664  ;;  %v1349_v14 = vadd.f32 1.0, %v2663_v11 }
 0x3eb   : > { %v2667_v15 = vpop.eup %2666 }
 0x3ec   : > { %v2669_v16 = vpop.eup %2668  ;;  %2676 = vrcp.f32 %v1349_v14  ;;  %2382 = vmatprep.mubr.msk.f32.mxu0 %vm198_vm0, %v2667_v15 }
 0x3ed   : > { %v2671_v17 = vpop.eup %2670  ;;  %2678 = vrcp.f32 %v1350_v12  ;;  %v1352_v18 = vadd.f32 1.0, %v2669_v16  ;;  %2383 = vmatmul.mubr.msk.f32.gmra.mrb[40].mxu0 %vm198_vm0, %v2665_v13 }
 0x3ee   : > { %v1351_v20 = vadd.f32 1.0, %v2671_v17 }
 0x3ef   : > { %v2673_v21 = vpop.eup %2672 }
 0x3f0   : > { %v2675_v22 = vpop.eup %2674  ;;  %2680 = vrcp.f32 %v1351_v20  ;;  %2385 = vmatprep.mubr.msk.f32.mxu0 %vm198_vm0, %v2673_v21 }
 0x3f1   : > { %2682 = vrcp.f32 %v1352_v18  ;;  %2386 = vmatmul.mubr.msk.f32.gmra.mrb[42].mxu0 %vm198_vm0, %v2675_v22 }
 0x3f6   : > { %v2677_v23 = vpop.eup %2676 }
 0x3f7   : > { %v2679_v25 = vpop.eup %2678  ;;  %2388 = vmatprep.mubr.msk.f32.mxu0 %vm198_vm0, %v2677_v23 }
 0x3f8   : > { %2389 = vmatmul.mubr.msk.f32.gmra.mrb[44].mxu0 %vm198_vm0, %v2679_v25 }
 0x3fa   : > { %v2681_v26 = vpop.eup %2680 }
 0x3fb   : > { %v2683_v27 = vpop.eup %2682  ;;  %2391 = vmatprep.mubr.msk.f32.mxu0 %vm198_vm0, %v2681_v26 }
 0x3fc   : > { %2392 = vmatmul.mubr.msk.f32.gmra.mrb[46].mxu0 %vm198_vm0, %v2683_v27 }
 0x4ad   : > { %v2372_v29 = vpop.f32.mrb[32].mxu0 }
 0x4ae   : > { %v1515_v19 = vadd.f32 %v2372_v29, %v2995_v28  ;;  %v1509_v30 = vpop.f32.mrb[33].mxu0 }
 0x4af   : > { %v1510_v31 = vadd.f32 %v2995_v28, %v1509_v30 }
 0x4b0   : > { %v2126_v32 = vmul.f32 -1.442695, %v1515_v19 }
 0x4b1   : > { %v2125_v33 = vmul.f32 -1.442695, %v1510_v31  ;;  %v2375_v34 = vpop.f32.mrb[34].mxu0 }
 0x4b2   : > { %2684 = vpow2.f32 %v2126_v32  ;;  %v1525_v35 = vadd.f32 %v2375_v34, %v2995_v28  ;;  %v1519_v24 = vpop.f32.mrb[35].mxu0 }
 0x4b3   : > { %2686 = vpow2.f32 %v2125_v33  ;;  %v1520_v36 = vadd.f32 %v2995_v28, %v1519_v24 }
 0x4b4   : > { %v2128_v37 = vmul.f32 -1.442695, %v1525_v35 }
 0x4b5   : > { %v2127_v38 = vmul.f32 -1.442695, %v1520_v36  ;;  %v2378_v39 = vpop.f32.mrb[36].mxu0 }
 0x4b6   : > { %2688 = vpow2.f32 %v2128_v37  ;;  %v1535_v40 = vadd.f32 %v2378_v39, %v2995_v28  ;;  %v1529_v41 = vpop.f32.mrb[37].mxu0 }
 0x4b7   : > { %2690 = vpow2.f32 %v2127_v38  ;;  %v1530_v42 = vadd.f32 %v2995_v28, %v1529_v41 }
 0x4b8   : > { %v2130_v43 = vmul.f32 -1.442695, %v1535_v40 }
 0x4b9   : > { %v2129_v44 = vmul.f32 -1.442695, %v1530_v42 }
 0x4ba   : > { %2692 = vpow2.f32 %v2130_v43 }
 0x4bb   : > { %2694 = vpow2.f32 %v2129_v44 }
 0x4bc   : > { %v2685_v45 = vpop.eup %2684  ;;  %v2381_v46 = vpop.f32.mrb[38].mxu0 }
 0x4bd   : > { %v2687_v47 = vpop.eup %2686  ;;  %v1637_v48 = vadd.f32 1.0, %v2685_v45  ;;  %v1545_v49 = vadd.f32 %v2381_v46, %v2995_v28  ;;  %v1539_v50 = vpop.f32.mrb[39].mxu0 }
 0x4be   : > { %v1636_v51 = vadd.f32 1.0, %v2687_v47  ;;  %v1540_v52 = vadd.f32 %v2995_v28, %v1539_v50 }
 0x4bf   : > { %2696 = vrcp.f32 %v1637_v48  ;;  %v2132_v54 = vmul.f32 -1.442695, %v1545_v49 }
 0x4c0   : > { %v2689_v55 = vpop.eup %2688  ;;  %2698 = vrcp.f32 %v1636_v51  ;;  %v2131_v56 = vmul.f32 -1.442695, %v1540_v52  ;;  %v2384_v57 = vpop.f32.mrb[40].mxu0 }
 0x4c1   : > { %v2691_v59 = vpop.eup %2690  ;;  %v1639_v60 = vadd.f32 1.0, %v2689_v55  ;;  %2700 = vpow2.f32 %v2132_v54  ;;  %v1555_v61 = vadd.f32 %v2384_v57, %v2995_v28  ;;  %v1549_v62 = vpop.f32.mrb[41].mxu0 }
 0x4c2   : > { %v1638_v63 = vadd.f32 1.0, %v2691_v59  ;;  %2702 = vpow2.f32 %v2131_v56  ;;  %v1550_v0 = vadd.f32 %v2995_v28, %v1549_v62 }
 0x4c3   : > { %2704 = vrcp.f32 %v1639_v60  ;;  %v2134_v1 = vmul.f32 -1.442695, %v1555_v61  ;;  %v2143_v61 = vld [vmem:[%s3076_s2 + $0x5] ss:$0 sm:$0xff] }
 0x4c4   : > { %v2693_v53 = vpop.eup %2692  ;;  %2706 = vrcp.f32 %v1638_v63  ;;  %v2133_v2 = vmul.f32 -1.442695, %v1550_v0  ;;  %v2387_v3 = vpop.f32.mrb[42].mxu0 }
 0x4c5   : > { %v2695_v4 = vpop.eup %2694  ;;  %v1641_v5 = vadd.f32 1.0, %v2693_v53  ;;  %2708 = vpow2.f32 %v2134_v1  ;;  %v1565_v6 = vadd.f32 %v2387_v3, %v2995_v28  ;;  %v1559_v7 = vpop.f32.mrb[43].mxu0 }
 0x4c6   : > { %v1640_v8 = vadd.f32 1.0, %v2695_v4  ;;  %2710 = vpow2.f32 %v2133_v2  ;;  %v1560_v58 = vadd.f32 %v2995_v28, %v1559_v7 }
 0x4c7   : > { %2712 = vrcp.f32 %v1641_v5  ;;  %v2136_v9 = vmul.f32 -1.442695, %v1565_v6 }
 0x4c8   : > { %2714 = vrcp.f32 %v1640_v8  ;;  %v2135_v10 = vmul.f32 -1.442695, %v1560_v58 }
 0x4c9   : > { %v2697_v11 = vpop.eup %2696  ;;  %2716 = vpow2.f32 %v2136_v9 }
 0x4ca   : > { %v2699_v12 = vpop.eup %2698  ;;  %2718 = vpow2.f32 %v2135_v10 }
 0x4cb   : > { %v2701_v13 = vpop.eup %2700  ;;  %v2390_v14 = vpop.f32.mrb[44].mxu0  ;;  %2396 = vmatprep.mubr.msk.f32.mxu1 %vm198_vm0, %v2699_v12 }
 0x4cc   : > { %v2703_v15 = vpop.eup %2702  ;;  %v1643_v16 = vadd.f32 1.0, %v2701_v13  ;;  %v1575_v17 = vadd.f32 %v2390_v14, %v2995_v28  ;;  %v1569_v18 = vpop.f32.mrb[45].mxu0  ;;  %2397 = vmatmul.mubr.msk.f32.vlgmr.msra.gmra.mrb[32].mxu1 %vm198_vm0, %v2697_v11 }
 0x4cd   : > { %v2705_v20 = vpop.eup %2704  ;;  %v1642_v21 = vadd.f32 1.0, %v2703_v15  ;;  %v1570_v22 = vadd.f32 %v2995_v28, %v1569_v18 }
 0x4ce   : > { %v2707_v23 = vpop.eup %2706  ;;  %2720 = vrcp.f32 %v1643_v16  ;;  %v2138_v25 = vmul.f32 -1.442695, %v1575_v17 }
 0x4cf   : > { %v2709_v26 = vpop.eup %2708  ;;  %2722 = vrcp.f32 %v1642_v21  ;;  %v2137_v27 = vmul.f32 -1.442695, %v1570_v22  ;;  %v2393_v29 = vpop.f32.mrb[46].mxu0  ;;  %2399 = vmatprep.mubr.msk.f32.mxu1 %vm198_vm0, %v2707_v23 }
 0x4d0   : > { %v2711_v19 = vpop.eup %2710  ;;  %v1645_v30 = vadd.f32 1.0, %v2709_v26  ;;  %2724 = vpow2.f32 %v2138_v25  ;;  %v1585_v31 = vadd.f32 %v2393_v29, %v2995_v28  ;;  %v1579_v32 = vpop.f32.mrb[47].mxu0  ;;  %2400 = vmatmul.mubr.msk.f32.gmra.mrb[34].mxu1 %vm198_vm0, %v2705_v20 }
 0x4d1   : > { %v2713_v33 = vpop.eup %2712  ;;  %v1644_v34 = vadd.f32 1.0, %v2711_v19  ;;  %2726 = vpow2.f32 %v2137_v27  ;;  %v1580_v35 = vadd.f32 %v2995_v28, %v1579_v32 }
 0x4d2   : > { %v2715_v24 = vpop.eup %2714  ;;  %2728 = vrcp.f32 %v1645_v30  ;;  %v2140_v36 = vmul.f32 -1.442695, %v1585_v31 }
 0x4d3   : > { %v2717_v37 = vpop.eup %2716  ;;  %2730 = vrcp.f32 %v1644_v34  ;;  %v2139_v38 = vmul.f32 -1.442695, %v1580_v35  ;;  %2402 = vmatprep.mubr.msk.f32.mxu1 %vm198_vm0, %v2715_v24 }
 0x4d4   : > { %v2719_v39 = vpop.eup %2718  ;;  %v1647_v40 = vadd.f32 1.0, %v2717_v37  ;;  %2732 = vpow2.f32 %v2140_v36  ;;  %2403 = vmatmul.mubr.msk.f32.gmra.mrb[36].mxu1 %vm198_vm0, %v2713_v33 }
 0x4d5   : > { %v1646_v41 = vadd.f32 1.0, %v2719_v39  ;;  %2734 = vpow2.f32 %v2139_v38 }
 0x4d7   : > { %2736 = vrcp.f32 %v1646_v41 }
 0x4d8   : > { %v2721_v42 = vpop.eup %2720  ;;  %2738 = vrcp.f32 %v1647_v40 }
 0x4d9   : > { %v2723_v43 = vpop.eup %2722 }
 0x4da   : > { %v2725_v28 = vpop.eup %2724  ;;  %2405 = vmatprep.mubr.msk.f32.mxu1 %vm198_vm0, %v2723_v43 }
 0x4db   : > { %v2727_v44 = vpop.eup %2726  ;;  %v1649_v45 = vadd.f32 1.0, %v2725_v28  ;;  %2406 = vmatmul.mubr.msk.f32.gmra.mrb[38].mxu1 %vm198_vm0, %v2721_v42 }
 0x4dc   : > { %v2729_v46 = vpop.eup %2728  ;;  %v1648_v47 = vadd.f32 1.0, %v2727_v44 }
 0x4dd   : > { %v2731_v48 = vpop.eup %2730 }
 0x4de   : > { %v2733_v49 = vpop.eup %2732  ;;  %2740 = vrcp.f32 %v1648_v47  ;;  %2408 = vmatprep.mubr.msk.f32.mxu1 %vm198_vm0, %v2731_v48 }
 0x4df   : > { %v2735_v50 = vpop.eup %2734  ;;  %2742 = vrcp.f32 %v1649_v45  ;;  %v1651_v51 = vadd.f32 1.0, %v2733_v49  ;;  %2409 = vmatmul.mubr.msk.f32.gmra.mrb[40].mxu1 %vm198_vm0, %v2729_v46 }
 0x4e0   : > { %v1650_v52 = vadd.f32 1.0, %v2735_v50 }
 0x4e1   : > { %v2737_v54 = vpop.eup %2736 }
 0x4e2   : > { %v2739_v55 = vpop.eup %2738  ;;  %2744 = vrcp.f32 %v1650_v52  ;;  %2411 = vmatprep.mubr.msk.f32.mxu1 %vm198_vm0, %v2737_v54 }
 0x4e3   : > { %2746 = vrcp.f32 %v1651_v51  ;;  %2412 = vmatmul.mubr.msk.f32.gmra.mrb[42].mxu1 %vm198_vm0, %v2739_v55 }
 0x4e8   : > { %v2741_v56 = vpop.eup %2740 }
 0x4e9   : > { %v2743_v57 = vpop.eup %2742  ;;  %2414 = vmatprep.mubr.msk.f32.mxu1 %vm198_vm0, %v2741_v56 }
 0x4ea   : > { %2415 = vmatmul.mubr.msk.f32.gmra.mrb[44].mxu1 %vm198_vm0, %v2743_v57 }
 0x4ec   : > { %v2745_v59 = vpop.eup %2744 }
 0x4ed   : > { %v2747_v60 = vpop.eup %2746  ;;  %2417 = vmatprep.mubr.msk.f32.mxu1 %vm198_vm0, %v2745_v59 }
 0x4ee   : > { %2418 = vmatmul.mubr.msk.f32.gmra.mrb[46].mxu1 %vm198_vm0, %v2747_v60 }
 0x59f   : > { %v2398_v62 = vpop.f32.mrb[32].mxu1 }
 0x5a0   : > { %v1814_v63 = vadd.f32 %v2398_v62, %v2143_v61  ;;  %v1808_v0 = vpop.f32.mrb[33].mxu1 }
 0x5a1   : > { %v1809_v1 = vadd.f32 %v2143_v61, %v1808_v0 }
 0x5a2   : > { %1888 = vst.msk [vmem:[%s3037_s21 + $0x8] sm:$0xff] %vm198_vm0, %v1814_v63 }
 0x5a3   : > { %1887 = vst.msk [vmem:[%s3037_s21] sm:$0xff] %vm198_vm0, %v1809_v1  ;;  %v2401_v53 = vpop.f32.mrb[34].mxu1 }
 0x5a4   : > { %v1824_v2 = vadd.f32 %v2401_v53, %v2143_v61  ;;  %v1818_v3 = vpop.f32.mrb[35].mxu1 }
 0x5a5   : > { %v1819_v4 = vadd.f32 %v2143_v61, %v1818_v3 }
 0x5a6   : > { %1890 = vst.msk [vmem:[%s3037_s21 + $0x18] sm:$0xff] %vm198_vm0, %v1824_v2 }
 0x5a7   : > { %1889 = vst.msk [vmem:[%s3037_s21 + $0x10] sm:$0xff] %vm198_vm0, %v1819_v4  ;;  %v2404_v5 = vpop.f32.mrb[36].mxu1 }
 0x5a8   : > { %v1834_v6 = vadd.f32 %v2404_v5, %v2143_v61  ;;  %v1828_v7 = vpop.f32.mrb[37].mxu1 }
 0x5a9   : > { %v1829_v8 = vadd.f32 %v2143_v61, %v1828_v7 }
 0x5aa   : > { %1892 = vst.msk [vmem:[%s3037_s21 + $0x28] sm:$0xff] %vm198_vm0, %v1834_v6 }
 0x5ab   : > { %1891 = vst.msk [vmem:[%s3037_s21 + $0x20] sm:$0xff] %vm198_vm0, %v1829_v8 }
 0x5ae   : > { %v2407_v58 = vpop.f32.mrb[38].mxu1 }
 0x5af   : > { %v1844_v9 = vadd.f32 %v2407_v58, %v2143_v61  ;;  %v1838_v10 = vpop.f32.mrb[39].mxu1 }
 0x5b0   : > { %v1839_v11 = vadd.f32 %v2143_v61, %v1838_v10 }
 0x5b1   : > { %1894 = vst.msk [vmem:[%s3037_s21 + $0x38] sm:$0xff] %vm198_vm0, %v1844_v9 }
 0x5b2   : > { %1893 = vst.msk [vmem:[%s3037_s21 + $0x30] sm:$0xff] %vm198_vm0, %v1839_v11  ;;  %v2410_v12 = vpop.f32.mrb[40].mxu1 }
 0x5b3   : > { %v1854_v13 = vadd.f32 %v2410_v12, %v2143_v61  ;;  %v1848_v14 = vpop.f32.mrb[41].mxu1 }
 0x5b4   : > { %v1849_v15 = vadd.f32 %v2143_v61, %v1848_v14 }
 0x5b5   : > { %1896 = vst.msk [vmem:[%s3037_s21 + $0x48] sm:$0xff] %vm198_vm0, %v1854_v13 }
 0x5b6   : > { %1895 = vst.msk [vmem:[%s3037_s21 + $0x40] sm:$0xff] %vm198_vm0, %v1849_v15  ;;  %v2413_v16 = vpop.f32.mrb[42].mxu1 }
 0x5b7   : > { %v1864_v17 = vadd.f32 %v2413_v16, %v2143_v61  ;;  %v1858_v18 = vpop.f32.mrb[43].mxu1 }
 0x5b8   : > { %v1859_v20 = vadd.f32 %v2143_v61, %v1858_v18 }
 0x5b9   : > { %1898 = vst.msk [vmem:[%s3037_s21 + $0x58] sm:$0xff] %vm198_vm0, %v1864_v17 }
 0x5ba   : > { %1897 = vst.msk [vmem:[%s3037_s21 + $0x50] sm:$0xff] %vm198_vm0, %v1859_v20 }
 0x5bd   : > { %v2416_v21 = vpop.f32.mrb[44].mxu1 }
 0x5be   : > { %v1874_v22 = vadd.f32 %v2416_v21, %v2143_v61  ;;  %v1868_v23 = vpop.f32.mrb[45].mxu1 }
 0x5bf   : > { %v1869_v25 = vadd.f32 %v2143_v61, %v1868_v23 }
 0x5c0   : > { %1900 = vst.msk [vmem:[%s3037_s21 + $0x68] sm:$0xff] %vm198_vm0, %v1874_v22 }
 0x5c1   : > { %1899 = vst.msk [vmem:[%s3037_s21 + $0x60] sm:$0xff] %vm198_vm0, %v1869_v25  ;;  %v2419_v26 = vpop.f32.mrb[46].mxu1 }
 0x5c2   : > { %v1884_v27 = vadd.f32 %v2419_v26, %v2143_v61  ;;  %v1878_v29 = vpop.f32.mrb[47].mxu1 }
 0x5c3   : > { %v1879_v19 = vadd.f32 %v2143_v61, %v1878_v29 }
 0x5c4   : > { %1902 = vst.msk [vmem:[%s3037_s21 + $0x78] sm:$0xff] %vm198_vm0, %v1884_v27 }
 0x5c5   : > { %1901 = vst.msk [vmem:[%s3037_s21 + $0x70] sm:$0xff] %vm198_vm0, %v1879_v19 }
 0x5c6 PF: > { %s13_s12 = sadd.s32 1, %s2754_s12  }
 0x5c7   : > { %p10_p4 = scmp.ge.s32.totalorder %s13_s12, 4  }
 0x5c9   :  { %12 = sbr.rel (!%p10_p4) target bundleno = 1 (0x1), region = 72 }

</bundles_post_ra>
